<compile_context>
chip_gen: v5e
topology: v5e:2x2
jax: 0.10.0
libtpu: 0.0.40
codegen_flags: <defaults>
</compile_context>

<pallas_src>
import math
import functools

import jax
import jax.numpy as jnp
from jax import lax
from jax.experimental import pallas as pl
from jax.experimental.pallas import tpu as pltpu


# ---------------------------------------------------------------------------
# Fused kernel: MLP -> BN affine -> split-weight Q/K projections -> scores -> softmax
# ---------------------------------------------------------------------------
def _fused_distance_kernel(x_ref, dw_ref, my_ref, ed_ref, eu_ref,
                           w1_ref, b1_ref, scale_ref, shift_ref, w2_ref, b2_ref,
                           wq_ref, wk_ref,
                           o1_ref, o2_ref, *, B, N, H, Te):
    f32 = jnp.float32

    # ---- dy_feat MLP: Linear -> ReLU -> BatchNorm1d(eval affine) -> dropout(id) -> Linear
    h = jnp.dot(x_ref[...], w1_ref[...], preferred_element_type=f32) + b1_ref[...]
    h = jnp.maximum(h, 0.0)                                  # ReLU
    h = h * scale_ref[...] + shift_ref[...]                  # BN (eval) folded affine
    dy = jnp.dot(h, w2_ref[...], preferred_element_type=f32) + b2_ref[...]   # [B*N, H]

    # ---- Q/K projections with WQ/WK split along the input-feature axis.
    # Feature layout of all_feat: [ dy (H) | D_W (Te) | M_Y (Te) | E (node_dim) ]
    wq = wq_ref[...]                                         # 1/sqrt(H) already folded in
    wk = wk_ref[...]

    q_common = (jnp.dot(dy,         wq[0:H, :],          preferred_element_type=f32)
                + jnp.dot(dw_ref[...], wq[H:H + Te, :],     preferred_element_type=f32)
                + jnp.dot(my_ref[...], wq[H + Te:H + 2 * Te, :], preferred_element_type=f32))
    k_common = (jnp.dot(dy,         wk[0:H, :],          preferred_element_type=f32)
                + jnp.dot(dw_ref[...], wk[H:H + Te, :],     preferred_element_type=f32)
                + jnp.dot(my_ref[...], wk[H + Te:H + 2 * Te, :], preferred_element_type=f32))

    # Batch-invariant node-embedding partials (computed once, reused for every batch).
    wq_e = wq[H + 2 * Te:, :]
    wk_e = wk[H + 2 * Te:, :]
    q_e = (jnp.dot(ed_ref[...], wq_e, preferred_element_type=f32),    # variant 0: E_d
           jnp.dot(eu_ref[...], wq_e, preferred_element_type=f32))    # variant 1: E_u
    k_e = (jnp.dot(ed_ref[...], wk_e, preferred_element_type=f32),
           jnp.dot(eu_ref[...], wk_e, preferred_element_type=f32))

    # ---- per-(variant, batch) block-diagonal scores + row softmax (static unrolled loop)
    out_refs = (o1_ref, o2_ref)
    for v in range(2):
        for b in range(B):
            q = q_common[b * N:(b + 1) * N, :] + q_e[v]      # [N, H]
            k = k_common[b * N:(b + 1) * N, :] + k_e[v]      # [N, H]
            # contract last dims directly (no explicit k transpose); scale folded in wq.
            s = lax.dot_general(q, k, (((1,), (1,)), ((), ())),
                                preferred_element_type=f32)  # [N, N]
            m = jnp.max(s, axis=-1, keepdims=True)
            e = jnp.exp(s - m)
            w = e * pl.reciprocal(jnp.sum(e, axis=-1, keepdims=True), approx=True)
            out_refs[v][b] = w.astype(out_refs[v].dtype)


# ---------------------------------------------------------------------------
# Forward wrapper (input slicing / flattening is cheap layout plumbing)
# ---------------------------------------------------------------------------
def distance_function_forward(X, E_d, E_u, D_W, M_Y, params):
    H = params["hidden_dim"]
    Te = D_W.shape[-1]

    D_Wl = D_W[:, -1, :, :]                           # [B, N, Te]
    M_Yl = M_Y[:, -1, :, :]                           # [B, N, Te]
    Xn = jnp.transpose(X[:, :, :, 0], (0, 2, 1))      # [B, N, L]
    B, N, L = Xn.shape

    X2d = Xn.reshape(B * N, L)
    DW2d = D_Wl.reshape(B * N, Te)
    MY2d = M_Yl.reshape(B * N, Te)

    # Fold the 1/sqrt(hidden_dim) score scale into WQ once (weight-only transform).
    wq_scaled = params["wq"] * jnp.float32(1.0 / math.sqrt(H))

    kern = functools.partial(_fused_distance_kernel, B=B, N=N, H=H, Te=Te)
    vmem = pl.BlockSpec(memory_space=pltpu.MemorySpace.VMEM)

    out1, out2 = pl.pallas_call(
        kern,
        out_shape=(jax.ShapeDtypeStruct((B, N, N), jnp.float32),
                   jax.ShapeDtypeStruct((B, N, N), jnp.float32)),
        in_specs=[vmem] * 13,
        out_specs=(vmem, vmem),
    )(X2d, DW2d, MY2d, E_d, E_u,
      params["w1"], params["b1"].reshape(1, -1),
      params["bn_scale"].reshape(1, -1), params["bn_shift"].reshape(1, -1),
      params["w2"], params["b2"].reshape(1, -1),
      wq_scaled, params["wk"])

    return [out1, out2]


# ---------------------------------------------------------------------------
# Pure-JAX reference (mirrors the PyTorch forward in eval mode) for checking
# ---------------------------------------------------------------------------
def distance_function_reference(X, E_d, E_u, D_W, M_Y, params):
    H = params["hidden_dim"]
    D_Wl = D_W[:, -1, :, :]
    M_Yl = M_Y[:, -1, :, :]
    Xn = jnp.transpose(X[:, :, :, 0], (0, 2, 1))
    B, N, L = Xn.shape
    X2d = Xn.reshape(B * N, L)
    h = jnp.maximum(X2d @ params["w1"] + params["b1"], 0.0)
    h = h * params["bn_scale"] + params["bn_shift"]
    dy = (h @ params["w2"] + params["b2"]).reshape(B, N, H)
    emb1 = jnp.broadcast_to(E_d[None], (B,) + E_d.shape)
    emb2 = jnp.broadcast_to(E_u[None], (B,) + E_u.shape)
    outs = []
    for emb in (emb1, emb2):
        Xc = jnp.concatenate([dy, D_Wl, M_Yl, emb], axis=-1)
        Q = Xc @ params["wq"]
        K = Xc @ params["wk"]
        s = jnp.einsum("bnh,bmh->bnm", Q, K) / math.sqrt(H)
        outs.append(jax.nn.softmax(s, axis=-1))
    return outs


# ---------------------------------------------------------------------------
def make_params(key, *, in_seq_len, hidden_dim, node_dim, time_emb_dim):
    ks = jax.random.split(key, 8)
    H2 = hidden_dim * 2
    all_feat = hidden_dim + node_dim + 2 * time_emb_dim
    # Linear weights stored as (in, out) so the kernel does x @ W
    w1 = jax.random.normal(ks[0], (in_seq_len, H2), jnp.float32) * 0.1
    b1 = jax.random.normal(ks[1], (H2,), jnp.float32) * 0.1
    w2 = jax.random.normal(ks[2], (H2, hidden_dim), jnp.float32) * 0.1
    b2 = jax.random.normal(ks[3], (hidden_dim,), jnp.float32) * 0.1
    wq = jax.random.normal(ks[4], (all_feat, hidden_dim), jnp.float32) * 0.1
    wk = jax.random.normal(ks[5], (all_feat, hidden_dim), jnp.float32) * 0.1
    # BatchNorm1d(2H) eval-mode stats, folded into scale/shift
    gamma = 1.0 + 0.1 * jax.random.normal(ks[6], (H2,), jnp.float32)
    beta = 0.1 * jax.random.normal(ks[7], (H2,), jnp.float32)
    running_mean = jnp.zeros((H2,), jnp.float32)
    running_var = jnp.ones((H2,), jnp.float32)
    eps = 1e-5
    bn_scale = gamma / jnp.sqrt(running_var + eps)
    bn_shift = beta - running_mean * bn_scale
    return dict(hidden_dim=hidden_dim, w1=w1, b1=b1, w2=w2, b2=b2,
                wq=wq, wk=wk, bn_scale=bn_scale, bn_shift=bn_shift)


if __name__ == "__main__":
    # model_args: num_hidden=32, node_hidden=16, in_seq_length=8, time_emb_dim=8
    B, L, N, C = 2, 8, 16, 1
    H, node_dim, time_emb_dim, T = 32, 16, 8, 4

    key = jax.random.PRNGKey(0)
    kx, ked, keu, kdw, kmy, kp = jax.random.split(key, 6)

    X = jax.random.normal(kx, (B, L, N, C), jnp.float32)
    E_d = jax.random.normal(ked, (N, node_dim), jnp.float32)
    E_u = jax.random.normal(keu, (N, node_dim), jnp.float32)
    D_W = jax.random.normal(kdw, (B, T, N, time_emb_dim), jnp.float32)
    M_Y = jax.random.normal(kmy, (B, T, N, time_emb_dim), jnp.float32)

    params = make_params(kp, in_seq_len=L, hidden_dim=H,
                         node_dim=node_dim, time_emb_dim=time_emb_dim)

    adj_list = distance_function_forward(X, E_d, E_u, D_W, M_Y, params)
    for a in adj_list:
        jax.block_until_ready(a)

    assert adj_list[0].shape == (B, N, N) and adj_list[1].shape == (B, N, N)
    # softmax rows sum to 1 (approx reciprocal -> loose tolerance)
    assert bool(jnp.allclose(jnp.sum(adj_list[0], axis=-1), 1.0, atol=1e-2))
    assert bool(jnp.allclose(jnp.sum(adj_list[1], axis=-1), 1.0, atol=1e-2))

    # compare against the pure-JAX reference of the PyTorch forward (eval mode)
    ref_list = distance_function_reference(X, E_d, E_u, D_W, M_Y, params)
    assert bool(jnp.allclose(adj_list[0], ref_list[0], atol=2e-2, rtol=2e-2))
    assert bool(jnp.allclose(adj_list[1], ref_list[1], atol=2e-2, rtol=2e-2))

    print("KERNEL_OK")
</pallas_src>

<mosaic_0001>
module attributes {stable_mosaic.version = 11 : i64} {
  func.func @_fused_distance_kernel(%arg0: memref<32x8xf32, #tpu.memory_space<vmem>>, %arg1: memref<32x8xf32, #tpu.memory_space<vmem>>, %arg2: memref<32x8xf32, #tpu.memory_space<vmem>>, %arg3: memref<16x16xf32, #tpu.memory_space<vmem>>, %arg4: memref<16x16xf32, #tpu.memory_space<vmem>>, %arg5: memref<8x64xf32, #tpu.memory_space<vmem>>, %arg6: memref<1x64xf32, #tpu.memory_space<vmem>>, %arg7: memref<1x64xf32, #tpu.memory_space<vmem>>, %arg8: memref<1x64xf32, #tpu.memory_space<vmem>>, %arg9: memref<64x32xf32, #tpu.memory_space<vmem>>, %arg10: memref<1x32xf32, #tpu.memory_space<vmem>>, %arg11: memref<64x32xf32, #tpu.memory_space<vmem>>, %arg12: memref<64x32xf32, #tpu.memory_space<vmem>>, %arg13: memref<2x16x16xf32, #tpu.memory_space<vmem>>, %arg14: memref<2x16x16xf32, #tpu.memory_space<vmem>>) attributes {dimension_semantics = [], scalar_prefetch = 0 : i64, scratch_operands = 0 : i64, tpu.core_type = #tpu.core_type<tc>} {
    %c0 = arith.constant 0 : index
    %c0_0 = arith.constant 0 : index
    %0 = vector.load %arg0[%c0, %c0_0] : memref<32x8xf32, #tpu.memory_space<vmem>>, vector<32x8xf32>
    %c0_1 = arith.constant 0 : index
    %c0_2 = arith.constant 0 : index
    %1 = vector.load %arg5[%c0_1, %c0_2] : memref<8x64xf32, #tpu.memory_space<vmem>>, vector<8x64xf32>
    %cst = arith.constant dense<0.000000e+00> : vector<32x64xf32>
    %2 = tpu.matmul %0, %1, %cst {dimension_numbers = #tpu.dot_dimension_numbers<[1], [0], [0], [1], [0, 0, 1, 1], [], []>} : vector<32x8xf32>, vector<8x64xf32>, vector<32x64xf32> -> vector<32x64xf32>
    %c0_3 = arith.constant 0 : index
    %c0_4 = arith.constant 0 : index
    %3 = vector.load %arg6[%c0_3, %c0_4] : memref<1x64xf32, #tpu.memory_space<vmem>>, vector<1x64xf32>
    %4 = vector.broadcast %3 : vector<1x64xf32> to vector<32x64xf32>
    %5 = arith.addf %2, %4 : vector<32x64xf32>
    %cst_5 = arith.constant 0.000000e+00 : f32
    %6 = vector.broadcast %cst_5 : f32 to vector<32x64xf32>
    %7 = arith.maximumf %5, %6 : vector<32x64xf32>
    %c0_6 = arith.constant 0 : index
    %c0_7 = arith.constant 0 : index
    %8 = vector.load %arg7[%c0_6, %c0_7] : memref<1x64xf32, #tpu.memory_space<vmem>>, vector<1x64xf32>
    %9 = vector.broadcast %8 : vector<1x64xf32> to vector<32x64xf32>
    %10 = arith.mulf %7, %9 : vector<32x64xf32>
    %c0_8 = arith.constant 0 : index
    %c0_9 = arith.constant 0 : index
    %11 = vector.load %arg8[%c0_8, %c0_9] : memref<1x64xf32, #tpu.memory_space<vmem>>, vector<1x64xf32>
    %12 = vector.broadcast %11 : vector<1x64xf32> to vector<32x64xf32>
    %13 = arith.addf %10, %12 : vector<32x64xf32>
    %c0_10 = arith.constant 0 : index
    %c0_11 = arith.constant 0 : index
    %14 = vector.load %arg9[%c0_10, %c0_11] : memref<64x32xf32, #tpu.memory_space<vmem>>, vector<64x32xf32>
    %cst_12 = arith.constant dense<0.000000e+00> : vector<32x32xf32>
    %15 = tpu.matmul %13, %14, %cst_12 {dimension_numbers = #tpu.dot_dimension_numbers<[1], [0], [0], [1], [0, 0, 1, 1], [], []>} : vector<32x64xf32>, vector<64x32xf32>, vector<32x32xf32> -> vector<32x32xf32>
    %c0_13 = arith.constant 0 : index
    %c0_14 = arith.constant 0 : index
    %16 = vector.load %arg10[%c0_13, %c0_14] : memref<1x32xf32, #tpu.memory_space<vmem>>, vector<1x32xf32>
    %17 = vector.broadcast %16 : vector<1x32xf32> to vector<32x32xf32>
    %18 = arith.addf %15, %17 : vector<32x32xf32>
    %c0_15 = arith.constant 0 : index
    %c0_16 = arith.constant 0 : index
    %19 = vector.load %arg11[%c0_15, %c0_16] : memref<64x32xf32, #tpu.memory_space<vmem>>, vector<64x32xf32>
    %c0_17 = arith.constant 0 : index
    %c0_18 = arith.constant 0 : index
    %20 = vector.load %arg12[%c0_17, %c0_18] : memref<64x32xf32, #tpu.memory_space<vmem>>, vector<64x32xf32>
    %21 = vector.extract_strided_slice %19 {offsets = [0, 0], sizes = [32, 32], strides = [1, 1]} : vector<64x32xf32> to vector<32x32xf32>
    %cst_19 = arith.constant dense<0.000000e+00> : vector<32x32xf32>
    %22 = tpu.matmul %18, %21, %cst_19 {dimension_numbers = #tpu.dot_dimension_numbers<[1], [0], [0], [1], [0, 0, 1, 1], [], []>} : vector<32x32xf32>, vector<32x32xf32>, vector<32x32xf32> -> vector<32x32xf32>
    %c0_20 = arith.constant 0 : index
    %c0_21 = arith.constant 0 : index
    %23 = vector.load %arg1[%c0_20, %c0_21] : memref<32x8xf32, #tpu.memory_space<vmem>>, vector<32x8xf32>
    %24 = vector.extract_strided_slice %19 {offsets = [32, 0], sizes = [8, 32], strides = [1, 1]} : vector<64x32xf32> to vector<8x32xf32>
    %cst_22 = arith.constant dense<0.000000e+00> : vector<32x32xf32>
    %25 = tpu.matmul %23, %24, %cst_22 {dimension_numbers = #tpu.dot_dimension_numbers<[1], [0], [0], [1], [0, 0, 1, 1], [], []>} : vector<32x8xf32>, vector<8x32xf32>, vector<32x32xf32> -> vector<32x32xf32>
    %26 = arith.addf %22, %25 : vector<32x32xf32>
    %c0_23 = arith.constant 0 : index
    %c0_24 = arith.constant 0 : index
    %27 = vector.load %arg2[%c0_23, %c0_24] : memref<32x8xf32, #tpu.memory_space<vmem>>, vector<32x8xf32>
    %28 = vector.extract_strided_slice %19 {offsets = [40, 0], sizes = [8, 32], strides = [1, 1]} : vector<64x32xf32> to vector<8x32xf32>
    %cst_25 = arith.constant dense<0.000000e+00> : vector<32x32xf32>
    %29 = tpu.matmul %27, %28, %cst_25 {dimension_numbers = #tpu.dot_dimension_numbers<[1], [0], [0], [1], [0, 0, 1, 1], [], []>} : vector<32x8xf32>, vector<8x32xf32>, vector<32x32xf32> -> vector<32x32xf32>
    %30 = arith.addf %26, %29 : vector<32x32xf32>
    %31 = vector.extract_strided_slice %20 {offsets = [0, 0], sizes = [32, 32], strides = [1, 1]} : vector<64x32xf32> to vector<32x32xf32>
    %cst_26 = arith.constant dense<0.000000e+00> : vector<32x32xf32>
    %32 = tpu.matmul %18, %31, %cst_26 {dimension_numbers = #tpu.dot_dimension_numbers<[1], [0], [0], [1], [0, 0, 1, 1], [], []>} : vector<32x32xf32>, vector<32x32xf32>, vector<32x32xf32> -> vector<32x32xf32>
    %c0_27 = arith.constant 0 : index
    %c0_28 = arith.constant 0 : index
    %33 = vector.load %arg1[%c0_27, %c0_28] : memref<32x8xf32, #tpu.memory_space<vmem>>, vector<32x8xf32>
    %34 = vector.extract_strided_slice %20 {offsets = [32, 0], sizes = [8, 32], strides = [1, 1]} : vector<64x32xf32> to vector<8x32xf32>
    %cst_29 = arith.constant dense<0.000000e+00> : vector<32x32xf32>
    %35 = tpu.matmul %33, %34, %cst_29 {dimension_numbers = #tpu.dot_dimension_numbers<[1], [0], [0], [1], [0, 0, 1, 1], [], []>} : vector<32x8xf32>, vector<8x32xf32>, vector<32x32xf32> -> vector<32x32xf32>
    %36 = arith.addf %32, %35 : vector<32x32xf32>
    %c0_30 = arith.constant 0 : index
    %c0_31 = arith.constant 0 : index
    %37 = vector.load %arg2[%c0_30, %c0_31] : memref<32x8xf32, #tpu.memory_space<vmem>>, vector<32x8xf32>
    %38 = vector.extract_strided_slice %20 {offsets = [40, 0], sizes = [8, 32], strides = [1, 1]} : vector<64x32xf32> to vector<8x32xf32>
    %cst_32 = arith.constant dense<0.000000e+00> : vector<32x32xf32>
    %39 = tpu.matmul %37, %38, %cst_32 {dimension_numbers = #tpu.dot_dimension_numbers<[1], [0], [0], [1], [0, 0, 1, 1], [], []>} : vector<32x8xf32>, vector<8x32xf32>, vector<32x32xf32> -> vector<32x32xf32>
    %40 = arith.addf %36, %39 : vector<32x32xf32>
    %41 = vector.extract_strided_slice %19 {offsets = [48, 0], sizes = [16, 32], strides = [1, 1]} : vector<64x32xf32> to vector<16x32xf32>
    %42 = vector.extract_strided_slice %20 {offsets = [48, 0], sizes = [16, 32], strides = [1, 1]} : vector<64x32xf32> to vector<16x32xf32>
    %c0_33 = arith.constant 0 : index
    %c0_34 = arith.constant 0 : index
    %43 = vector.load %arg3[%c0_33, %c0_34] : memref<16x16xf32, #tpu.memory_space<vmem>>, vector<16x16xf32>
    %cst_35 = arith.constant dense<0.000000e+00> : vector<16x32xf32>
    %44 = tpu.matmul %43, %41, %cst_35 {dimension_numbers = #tpu.dot_dimension_numbers<[1], [0], [0], [1], [0, 0, 1, 1], [], []>} : vector<16x16xf32>, vector<16x32xf32>, vector<16x32xf32> -> vector<16x32xf32>
    %c0_36 = arith.constant 0 : index
    %c0_37 = arith.constant 0 : index
    %45 = vector.load %arg4[%c0_36, %c0_37] : memref<16x16xf32, #tpu.memory_space<vmem>>, vector<16x16xf32>
    %cst_38 = arith.constant dense<0.000000e+00> : vector<16x32xf32>
    %46 = tpu.matmul %45, %41, %cst_38 {dimension_numbers = #tpu.dot_dimension_numbers<[1], [0], [0], [1], [0, 0, 1, 1], [], []>} : vector<16x16xf32>, vector<16x32xf32>, vector<16x32xf32> -> vector<16x32xf32>
    %c0_39 = arith.constant 0 : index
    %c0_40 = arith.constant 0 : index
    %47 = vector.load %arg3[%c0_39, %c0_40] : memref<16x16xf32, #tpu.memory_space<vmem>>, vector<16x16xf32>
    %cst_41 = arith.constant dense<0.000000e+00> : vector<16x32xf32>
    %48 = tpu.matmul %47, %42, %cst_41 {dimension_numbers = #tpu.dot_dimension_numbers<[1], [0], [0], [1], [0, 0, 1, 1], [], []>} : vector<16x16xf32>, vector<16x32xf32>, vector<16x32xf32> -> vector<16x32xf32>
    %c0_42 = arith.constant 0 : index
    %c0_43 = arith.constant 0 : index
    %49 = vector.load %arg4[%c0_42, %c0_43] : memref<16x16xf32, #tpu.memory_space<vmem>>, vector<16x16xf32>
    %cst_44 = arith.constant dense<0.000000e+00> : vector<16x32xf32>
    %50 = tpu.matmul %49, %42, %cst_44 {dimension_numbers = #tpu.dot_dimension_numbers<[1], [0], [0], [1], [0, 0, 1, 1], [], []>} : vector<16x16xf32>, vector<16x32xf32>, vector<16x32xf32> -> vector<16x32xf32>
    %51 = vector.extract_strided_slice %30 {offsets = [0, 0], sizes = [16, 32], strides = [1, 1]} : vector<32x32xf32> to vector<16x32xf32>
    %52 = arith.addf %51, %44 : vector<16x32xf32>
    %53 = vector.extract_strided_slice %40 {offsets = [0, 0], sizes = [16, 32], strides = [1, 1]} : vector<32x32xf32> to vector<16x32xf32>
    %54 = arith.addf %53, %48 : vector<16x32xf32>
    %cst_45 = arith.constant dense<0.000000e+00> : vector<16x16xf32>
    %55 = tpu.matmul %52, %54, %cst_45 {dimension_numbers = #tpu.dot_dimension_numbers<[1], [1], [0], [0], [0, 0, 1, 0], [], []>} : vector<16x32xf32>, vector<16x32xf32>, vector<16x16xf32> -> vector<16x16xf32>
    %cst_46 = arith.constant dense<0xFF800000> : vector<16xf32>
    %56 = vector.multi_reduction <maximumf>, %55, %cst_46 [1] : vector<16x16xf32> to vector<16xf32>
    %57 = vector.shape_cast %56 : vector<16xf32> to vector<16x1xf32>
    %58 = vector.broadcast %57 : vector<16x1xf32> to vector<16x16xf32>
    %59 = arith.subf %55, %58 : vector<16x16xf32>
    %60 = math.exp %59 : vector<16x16xf32>
    %cst_47 = arith.constant dense<0.000000e+00> : vector<16xf32>
    %61 = vector.multi_reduction <add>, %60, %cst_47 [1] : vector<16x16xf32> to vector<16xf32>
    %62 = vector.shape_cast %61 : vector<16xf32> to vector<16x1xf32>
    %63 = tpu.reciprocal %62 {approx = true} : vector<16x1xf32> -> vector<16x1xf32>
    %64 = vector.broadcast %63 : vector<16x1xf32> to vector<16x16xf32>
    %65 = arith.mulf %60, %64 : vector<16x16xf32>
    %c0_48 = arith.constant 0 : index
    %c0_49 = arith.constant 0 : index
    %c0_50 = arith.constant 0 : index
    %66 = vector.load %arg13[%c0_48, %c0_49, %c0_50] : memref<2x16x16xf32, #tpu.memory_space<vmem>>, vector<1x16x16xf32>
    %67 = vector.shape_cast %66 : vector<1x16x16xf32> to vector<16x16xf32>
    %68 = vector.shape_cast %65 : vector<16x16xf32> to vector<1x16x16xf32>
    tpu.vector_store %arg13[%c0_48, %c0_49, %c0_50], %68 {strides = array<i32>} : memref<2x16x16xf32, #tpu.memory_space<vmem>>, vector<1x16x16xf32>,
    %69 = vector.extract_strided_slice %30 {offsets = [16, 0], sizes = [16, 32], strides = [1, 1]} : vector<32x32xf32> to vector<16x32xf32>
    %70 = arith.addf %69, %44 : vector<16x32xf32>
    %71 = vector.extract_strided_slice %40 {offsets = [16, 0], sizes = [16, 32], strides = [1, 1]} : vector<32x32xf32> to vector<16x32xf32>
    %72 = arith.addf %71, %48 : vector<16x32xf32>
    %cst_51 = arith.constant dense<0.000000e+00> : vector<16x16xf32>
    %73 = tpu.matmul %70, %72, %cst_51 {dimension_numbers = #tpu.dot_dimension_numbers<[1], [1], [0], [0], [0, 0, 1, 0], [], []>} : vector<16x32xf32>, vector<16x32xf32>, vector<16x16xf32> -> vector<16x16xf32>
    %cst_52 = arith.constant dense<0xFF800000> : vector<16xf32>
    %74 = vector.multi_reduction <maximumf>, %73, %cst_52 [1] : vector<16x16xf32> to vector<16xf32>
    %75 = vector.shape_cast %74 : vector<16xf32> to vector<16x1xf32>
    %76 = vector.broadcast %75 : vector<16x1xf32> to vector<16x16xf32>
    %77 = arith.subf %73, %76 : vector<16x16xf32>
    %78 = math.exp %77 : vector<16x16xf32>
    %cst_53 = arith.constant dense<0.000000e+00> : vector<16xf32>
    %79 = vector.multi_reduction <add>, %78, %cst_53 [1] : vector<16x16xf32> to vector<16xf32>
    %80 = vector.shape_cast %79 : vector<16xf32> to vector<16x1xf32>
    %81 = tpu.reciprocal %80 {approx = true} : vector<16x1xf32> -> vector<16x1xf32>
    %82 = vector.broadcast %81 : vector<16x1xf32> to vector<16x16xf32>
    %83 = arith.mulf %78, %82 : vector<16x16xf32>
    %c1 = arith.constant 1 : index
    %c0_54 = arith.constant 0 : index
    %c0_55 = arith.constant 0 : index
    %84 = vector.load %arg13[%c1, %c0_54, %c0_55] : memref<2x16x16xf32, #tpu.memory_space<vmem>>, vector<1x16x16xf32>
    %85 = vector.shape_cast %84 : vector<1x16x16xf32> to vector<16x16xf32>
    %86 = vector.shape_cast %83 : vector<16x16xf32> to vector<1x16x16xf32>
    tpu.vector_store %arg13[%c1, %c0_54, %c0_55], %86 {strides = array<i32>} : memref<2x16x16xf32, #tpu.memory_space<vmem>>, vector<1x16x16xf32>,
    %87 = vector.extract_strided_slice %30 {offsets = [0, 0], sizes = [16, 32], strides = [1, 1]} : vector<32x32xf32> to vector<16x32xf32>
    %88 = arith.addf %87, %46 : vector<16x32xf32>
    %89 = vector.extract_strided_slice %40 {offsets = [0, 0], sizes = [16, 32], strides = [1, 1]} : vector<32x32xf32> to vector<16x32xf32>
    %90 = arith.addf %89, %50 : vector<16x32xf32>
    %cst_56 = arith.constant dense<0.000000e+00> : vector<16x16xf32>
    %91 = tpu.matmul %88, %90, %cst_56 {dimension_numbers = #tpu.dot_dimension_numbers<[1], [1], [0], [0], [0, 0, 1, 0], [], []>} : vector<16x32xf32>, vector<16x32xf32>, vector<16x16xf32> -> vector<16x16xf32>
    %cst_57 = arith.constant dense<0xFF800000> : vector<16xf32>
    %92 = vector.multi_reduction <maximumf>, %91, %cst_57 [1] : vector<16x16xf32> to vector<16xf32>
    %93 = vector.shape_cast %92 : vector<16xf32> to vector<16x1xf32>
    %94 = vector.broadcast %93 : vector<16x1xf32> to vector<16x16xf32>
    %95 = arith.subf %91, %94 : vector<16x16xf32>
    %96 = math.exp %95 : vector<16x16xf32>
    %cst_58 = arith.constant dense<0.000000e+00> : vector<16xf32>
    %97 = vector.multi_reduction <add>, %96, %cst_58 [1] : vector<16x16xf32> to vector<16xf32>
    %98 = vector.shape_cast %97 : vector<16xf32> to vector<16x1xf32>
    %99 = tpu.reciprocal %98 {approx = true} : vector<16x1xf32> -> vector<16x1xf32>
    %100 = vector.broadcast %99 : vector<16x1xf32> to vector<16x16xf32>
    %101 = arith.mulf %96, %100 : vector<16x16xf32>
    %c0_59 = arith.constant 0 : index
    %c0_60 = arith.constant 0 : index
    %c0_61 = arith.constant 0 : index
    %102 = vector.load %arg14[%c0_59, %c0_60, %c0_61] : memref<2x16x16xf32, #tpu.memory_space<vmem>>, vector<1x16x16xf32>
    %103 = vector.shape_cast %102 : vector<1x16x16xf32> to vector<16x16xf32>
    %104 = vector.shape_cast %101 : vector<16x16xf32> to vector<1x16x16xf32>
    tpu.vector_store %arg14[%c0_59, %c0_60, %c0_61], %104 {strides = array<i32>} : memref<2x16x16xf32, #tpu.memory_space<vmem>>, vector<1x16x16xf32>,
    %105 = vector.extract_strided_slice %30 {offsets = [16, 0], sizes = [16, 32], strides = [1, 1]} : vector<32x32xf32> to vector<16x32xf32>
    %106 = arith.addf %105, %46 : vector<16x32xf32>
    %107 = vector.extract_strided_slice %40 {offsets = [16, 0], sizes = [16, 32], strides = [1, 1]} : vector<32x32xf32> to vector<16x32xf32>
    %108 = arith.addf %107, %50 : vector<16x32xf32>
    %cst_62 = arith.constant dense<0.000000e+00> : vector<16x16xf32>
    %109 = tpu.matmul %106, %108, %cst_62 {dimension_numbers = #tpu.dot_dimension_numbers<[1], [1], [0], [0], [0, 0, 1, 0], [], []>} : vector<16x32xf32>, vector<16x32xf32>, vector<16x16xf32> -> vector<16x16xf32>
    %cst_63 = arith.constant dense<0xFF800000> : vector<16xf32>
    %110 = vector.multi_reduction <maximumf>, %109, %cst_63 [1] : vector<16x16xf32> to vector<16xf32>
    %111 = vector.shape_cast %110 : vector<16xf32> to vector<16x1xf32>
    %112 = vector.broadcast %111 : vector<16x1xf32> to vector<16x16xf32>
    %113 = arith.subf %109, %112 : vector<16x16xf32>
    %114 = math.exp %113 : vector<16x16xf32>
    %cst_64 = arith.constant dense<0.000000e+00> : vector<16xf32>
    %115 = vector.multi_reduction <add>, %114, %cst_64 [1] : vector<16x16xf32> to vector<16xf32>
    %116 = vector.shape_cast %115 : vector<16xf32> to vector<16x1xf32>
    %117 = tpu.reciprocal %116 {approx = true} : vector<16x1xf32> -> vector<16x1xf32>
    %118 = vector.broadcast %117 : vector<16x1xf32> to vector<16x16xf32>
    %119 = arith.mulf %114, %118 : vector<16x16xf32>
    %c1_65 = arith.constant 1 : index
    %c0_66 = arith.constant 0 : index
    %c0_67 = arith.constant 0 : index
    %120 = vector.load %arg14[%c1_65, %c0_66, %c0_67] : memref<2x16x16xf32, #tpu.memory_space<vmem>>, vector<1x16x16xf32>
    %121 = vector.shape_cast %120 : vector<1x16x16xf32> to vector<16x16xf32>
    %122 = vector.shape_cast %119 : vector<16x16xf32> to vector<1x16x16xf32>
    tpu.vector_store %arg14[%c1_65, %c0_66, %c0_67], %122 {strides = array<i32>} : memref<2x16x16xf32, #tpu.memory_space<vmem>>, vector<1x16x16xf32>,
    return
  }
}

</mosaic_0001>

<bundles_post_ra>
// kernel: tpu_custom_call.1
= control target key start
LH: loop header
LB: loop body
LE: loop exit
PB: predicated region body
PF: predicated region fallthrough
CT: control target
= control target key end

     0   :  { %20 = vsyncpa [#allocation3], 0  ;;  %vm57_vm0 = vcmask 64512   ;;  %s1271_s0 = inlined_call_operand.vmem [shape: f32[32,8], index: 0, kind: input, shape index: {}]   ;;  %s1272_s1 = inlined_call_operand.vmem [shape: f32[32,8], index: 1, kind: input, shape index: {}]   ;;  %s1273_s2 = inlined_call_operand.vmem [shape: f32[32,8], index: 2, kind: input, shape index: {}]   ;;  %s1274_s3 = inlined_call_operand.vmem [shape: f32[16,16], index: 3, kind: input, shape index: {}]   ;;  %s1275_s4 = inlined_call_operand.vmem [shape: f32[16,16], index: 4, kind: input, shape index: {}]   ;;  %s1276_s5 = inlined_call_operand.vmem [shape: f32[8,64], index: 5, kind: input, shape index: {}]   ;;  %s1277_s6 = inlined_call_operand.vmem [shape: f32[1,64], index: 6, kind: input, shape index: {}]   ;;  %s1278_s7 = inlined_call_operand.vmem [shape: f32[1,64], index: 7, kind: input, shape index: {}]   ;;  %s1279_s8 = inlined_call_operand.vmem [shape: f32[1,64], index: 8, kind: input, shape index: {}]   ;;  %s1280_s9 = inlined_call_operand.vmem [shape: f32[64,32], index: 9, kind: input, shape index: {}]   ;;  %s1281_s10 = inlined_call_operand.vmem [shape: f32[1,32], index: 10, kind: input, shape index: {}]   ;;  %s1282_s11 = inlined_call_operand.vmem [shape: f32[64,32], index: 11, kind: input, shape index: {}]   ;;  %s1283_s12 = inlined_call_operand.vmem [shape: f32[64,32], index: 12, kind: input, shape index: {}]   ;;  %s1284_s13 = inlined_call_operand.hbm [shape: f32[2,16,16], index: 13, kind: output, shape index: {0}]   ;;  %s1285_s14 = inlined_call_operand.hbm [shape: f32[2,16,16], index: 14, kind: output, shape index: {1}]  }
   0x1   :  { %v52_v0 = vld [vmem:[%s1276_s5] sm:$0xff]  ;;  %v126_v2 = vld [vmem:[%s1280_s9 + $0x38] sm:$0xff]  ;;  %v125_v3 = vld [vmem:[%s1280_s9 + $0x30] sm:$0xff] }
   0x2   :  { %v48_v1 = vld [vmem:[%s1271_s0] sm:$0xff]  ;;  %85 = vmatpush.msra.mxu0 %v52_v0  ;;  %871 = vmatpush.msra.mxu1 %v126_v2  ;;  %v124_v4 = vld [vmem:[%s1280_s9 + $0x28] sm:$0xff] }
   0x3   :  { %815 = vmatmul.msk.f32.vlgmr.msra.gmra.mxu0 %vm57_vm0, %v48_v1 }
   0x4   :  { %152 = vmatpush.msrb.mxu0 %v126_v2  ;;  %872 = vmatpush.msra.mxu1 %v125_v3 }
   0x5   :  { %21 = vsyncpa [#allocation5], 0  ;;  %v123_v5 = vld [vmem:[%s1280_s9 + $0x20] sm:$0xff]  ;;  %v49_v6 = vld [vmem:[%s1271_s0 + $0x8] sm:$0xff]  ;;  %vm131_vm1 = vcmask 523264   ;;  %vm418_vm2 = vcmask 130048  }
   0x6   :  { %153 = vmatpush.msrb.mxu0 %v125_v3  ;;  %873 = vmatpush.msra.mxu1 %v124_v4  ;;  %v50_v7 = vld [vmem:[%s1271_s0 + $0x10] sm:$0xff]  ;;  %v51_v8 = vld [vmem:[%s1271_s0 + $0x18] sm:$0xff]  ;;  %v120_v11 = vld [vmem:[%s1280_s9 + $0x8] sm:$0xff]  ;;  %vm234_vm3 = vcmask 261120   ;;  %s972_s17 = smov 128   ;;  %s973_s18 = smov 8  }
   0x7   :  { %v122_v9 = vld [vmem:[%s1280_s9 + $0x18] sm:$0xff]  ;;  %v121_v10 = vld [vmem:[%s1280_s9 + $0x10] sm:$0xff]  ;;  %v119_v12 = vld [vmem:[%s1280_s9] sm:$0xff]  ;;  %s974_s19 = smov [#allocation4]   ;;  %s798_s20 = sshll.u32 %s1285_s14, 4  ;;  %s799_s20 = int_to_ptr.hbm [resolvable:$true] %s798_s20 }
   0x8   :  { %154 = vmatpush.msrb.mxu0 %v124_v4  ;;  %874 = vmatpush.msra.mxu1 %v123_v5  ;;  %v883_v13 = vld [vmem:[%s1277_s6] ss:$0 sm:$0xff]  ;;  %v178_v22 = vld [vmem:[%s1282_s11 + $0x28] sm:$0xff]  ;;  %v191_v33 = vld [vmem:[%s1272_s1 + $0x10] sm:$0xff]  ;;  %s796_s0 = sshll.u32 %s974_s19, 4  ;;  %s797_s0 = int_to_ptr.vmem [resolvable:$true] %s796_s0 }
   0x9   :  { %v884_v16 = vld [vmem:[%s1278_s7] ss:$0 sm:$0xff]  ;;  %v190_v26 = vld [vmem:[%s1272_s1 + $0x8] sm:$0xff]  ;;  %v176_v36 = vld [vmem:[%s1282_s11 + $0x18] sm:$0xff] }
   0xa   :  { %155 = vmatpush.msrb.mxu0 %v123_v5  ;;  %875 = vmatpush.msra.mxu1 %v122_v9  ;;  %v177_v17 = vld [vmem:[%s1282_s11 + $0x20] sm:$0xff]  ;;  %v175_v37 = vld [vmem:[%s1282_s11 + $0x10] sm:$0xff]  ;;  %v277_v39 = vld [vmem:[%s1273_s2 + $0x8] sm:$0xff] }
   0xb   :  { %816 = vmatmul.msk.f32.gmra.mxu0 %vm57_vm0, %v49_v6  ;;  %v189_v18 = vld [vmem:[%s1272_s1] sm:$0xff]  ;;  %220 = vmatpush.msra.mxu2 %v177_v17  ;;  %v192_v42 = vld [vmem:[%s1272_s1 + $0x18] sm:$0xff]  ;;  %v278_v46 = vld [vmem:[%s1273_s2 + $0x10] sm:$0xff] }
   0xc   :  { %156 = vmatpush.msrb.mxu0 %v122_v9  ;;  %876 = vmatpush.msra.mxu1 %v121_v10  ;;  %v185_v19 = vld [vmem:[%s1283_s12 + $0x20] sm:$0xff]  ;;  %v174_v48 = vld [vmem:[%s1282_s11 + $0x8] sm:$0xff]  ;;  %v180_v50 = vld [vmem:[%s1282_s11 + $0x38] sm:$0xff] }
   0xd   :  { %v885_v21 = vld [vmem:[%s1279_s8] ss:$0 sm:$0xff]  ;;  %823 = vmatmul.msk.f32.vlgmr.msra.gmra.mxu2 %vm57_vm0, %v189_v18  ;;  %259 = vmatpush.msra.mxu3 %v176_v36  ;;  %v279_v51 = vld [vmem:[%s1273_s2 + $0x18] sm:$0xff]  ;;  %v179_v52 = vld [vmem:[%s1282_s11 + $0x30] sm:$0xff]  ;;  %s785_s8 = sshll.u32 %s1284_s13, 4  ;;  %s786_s8 = int_to_ptr.hbm [resolvable:$true] %s785_s8 }
   0xe   :  { %157 = vmatpush.msrb.mxu0 %v121_v10  ;;  %877 = vmatpush.msra.mxu1 %v120_v11  ;;  %v276_v30 = vld [vmem:[%s1273_s2] sm:$0xff]  ;;  %v184_v54 = vld [vmem:[%s1283_s12 + $0x18] sm:$0xff]  ;;  %v186_v55 = vld [vmem:[%s1283_s12 + $0x28] sm:$0xff] }
   0xf   :  { %340 = vmatpush.msrb.mxu2 %v185_v19  ;;  %260 = vmatpush.msra.mxu3 %v175_v37  ;;  %v173_v49 = vld [vmem:[%s1282_s11] sm:$0xff]  ;;  %v449_v57 = vld [vmem:[%s1275_s4 + $0x8] sm:$0xff]  ;;  %v183_v58 = vld [vmem:[%s1283_s12 + $0x10] sm:$0xff] }
  0x10   :  { %158 = vmatpush.msrb.mxu0 %v120_v11  ;;  %878 = vmatpush.msra.mxu1 %v119_v12  ;;  %v448_v53 = vld [vmem:[%s1275_s4] sm:$0xff]  ;;  %v417_v59 = vld [vmem:[%s1274_s3 + $0x8] sm:$0xff]  ;;  %v188_v1 = vld [vmem:[%s1283_s12 + $0x38] sm:$0xff] }
  0x11   :  { %261 = vmatpush.msra.mxu3 %v174_v48  ;;  %470 = vmatpush.msra.mxu2 %v180_v50  ;;  %v416_v56 = vld [vmem:[%s1274_s3] sm:$0xff]  ;;  %v182_v60 = vld [vmem:[%s1283_s12 + $0x8] sm:$0xff]  ;;  %v187_v4 = vld [vmem:[%s1283_s12 + $0x30] sm:$0xff] }
  0x12   :  { %159 = vmatpush.msrb.mxu0 %v119_v12  ;;  %398 = vmatpush.msrb.mxu1 %v186_v55  ;;  %v181_v61 = vld [vmem:[%s1283_s12] sm:$0xff]  ;;  %s971_s12 = smov [#allocation2]  }
  0x13   :  { %817 = vmatmul.msk.f32.gmra.mxu0 %vm57_vm0, %v50_v7  ;;  %262 = vmatpush.msra.mxu3 %v173_v49  ;;  %v886_v62 = vld [vmem:[%s1281_s10] ss:$0 sm:$0xff]  ;;  %s783_s30 = sshll.u32 %s971_s12, 4  ;;  %s784_s30 = int_to_ptr.vmem [resolvable:$true] %s783_s30 }
  0x14   :  { %307 = vmatpush.msra.mxu0 %v178_v22  ;;  %471 = vmatpush.msra.mxu2 %v179_v52 }
  0x15   :  { %824 = vmatmul.msk.f32.gmra.mxu2 %vm57_vm0, %v190_v26  ;;  %366 = vmatpush.msrb.mxu3 %v184_v54 }
  0x17   :  { %367 = vmatpush.msrb.mxu3 %v183_v58 }
  0x19   :  { %368 = vmatpush.msrb.mxu3 %v182_v60 }
  0x1b   :  { %818 = vmatmul.msk.f32.gmra.mxu0 %vm57_vm0, %v51_v8  ;;  %369 = vmatpush.msrb.mxu3 %v181_v61 }
  0x1d   :  { %825 = vmatmul.msk.f32.gmra.mxu2 %vm57_vm0, %v191_v33 }
  0x25   :  { %826 = vmatmul.msk.f32.gmra.mxu2 %vm57_vm0, %v192_v42 }
  0x2d   :  { %835 = vmatmul.msk.f32.vlgmr.msrb.gmra.mxu2 %vm57_vm0, %v189_v18 }
  0x35   :  { %836 = vmatmul.msk.f32.gmra.mxu2 %vm57_vm0, %v190_v26 }
  0x3d   :  { %837 = vmatmul.msk.f32.gmra.mxu2 %vm57_vm0, %v191_v33 }
  0x45   :  { %838 = vmatmul.msk.f32.gmra.mxu2 %vm57_vm0, %v192_v42 }
  0x4d   :  { %849 = vmatmul.msk.f32.vlgmr.msra.gmra.mxu2 %vm418_vm2, %v448_v53 }
  0x55   :  { %850 = vmatmul.msk.f32.gmra.mxu2 %vm418_vm2, %v449_v57 }
  0x80   :  { %v87_v14 = vpop.f32.mrf.mxu0 }
  0x81   :  { %v88_v15 = vadd.f32 %v883_v13, %v87_v14 }
  0x83   :  { %v99_v20 = vmax.f32 %v88_v15, 0.0 }
  0x85   :  { %v107_v23 = vmul.f32 %v884_v16, %v99_v20 }
  0x87   :  { %v115_v24 = vadd.f32 %v885_v21, %v107_v23 }
  0x88   :  { %v90_v25 = vpop.f32.mrf.mxu0 }
  0x89   :  { %v91_v27 = vadd.f32 %v883_v13, %v90_v25  ;;  %819 = vmatmul.msk.f32.vlgmr.msrb.gmra.mxu0 %vm131_vm1, %v115_v24 }
  0x8a   :  { %439 = vmatpush.msrb.mxu0 %v180_v50 }
  0x8b   :  { %v100_v28 = vmax.f32 %v91_v27, 0.0 }
  0x8c   :  { %440 = vmatpush.msrb.mxu0 %v179_v52 }
  0x8d   :  { %v108_v29 = vmul.f32 %v884_v16, %v100_v28 }
  0x8f   :  { %v116_v31 = vadd.f32 %v885_v21, %v108_v29 }
  0x90   :  { %v93_v32 = vpop.f32.mrf.mxu0  ;;  %v222_v9 = vpop.f32.mrf.mxu2 }
  0x91   :  { %v94_v34 = vadd.f32 %v883_v13, %v93_v32  ;;  %820 = vmatmul.msk.f32.vlgmr.msra.gmra.mxu1 %vm131_vm1, %v116_v31  ;;  %831 = vmatmul.msk.f32.vlgmr.msra.gmra.mxu0 %vm57_vm0, %v276_v30 }
  0x92   :  { %516 = vmatpush.msra.mxu1 %v188_v1 }
  0x93   :  { %v101_v35 = vmax.f32 %v94_v34, 0.0 }
  0x94   :  { %517 = vmatpush.msra.mxu1 %v187_v4 }
  0x95   :  { %v109_v38 = vmul.f32 %v884_v16, %v101_v35 }
  0x97   :  { %v117_v40 = vadd.f32 %v885_v21, %v109_v38 }
  0x98   :  { %v96_v41 = vpop.f32.mrf.mxu0  ;;  %v225_v10 = vpop.f32.mrf.mxu2 }
  0x99   :  { %v97_v43 = vadd.f32 %v883_v13, %v96_v41  ;;  %821 = vmatmul.msk.f32.gmra.mxu1 %vm131_vm1, %v117_v40  ;;  %832 = vmatmul.msk.f32.gmra.mxu0 %vm57_vm0, %v277_v39 }
  0x9b   :  { %v102_v44 = vmax.f32 %v97_v43, 0.0 }
  0x9d   :  { %v110_v45 = vmul.f32 %v884_v16, %v102_v44 }
  0x9f   :  { %v118_v47 = vadd.f32 %v885_v21, %v110_v45 }
  0xa0   :  { %v228_v11 = vpop.f32.mrf.mxu2 }
  0xa1   :  { %822 = vmatmul.msk.f32.gmra.mxu1 %vm131_vm1, %v118_v47  ;;  %833 = vmatmul.msk.f32.gmra.mxu0 %vm57_vm0, %v278_v46 }
  0xa8   :  { %v231_v13 = vpop.f32.mrf.mxu2 }
  0xa9   :  { %834 = vmatmul.msk.f32.gmra.mxu0 %vm57_vm0, %v279_v51  ;;  %843 = vmatmul.msk.f32.vlgmr.msrb.gmra.mxu1 %vm57_vm0, %v276_v30 }
  0xb0   :  { %v342_v16 = vpop.f32.mrf.mxu2 }
  0xb1   :  { %847 = vmatmul.msk.f32.vlgmr.msrb.gmra.mxu0 %vm418_vm2, %v416_v56  ;;  %844 = vmatmul.msk.f32.gmra.mxu1 %vm57_vm0, %v277_v39 }
  0xb8   :  { %v345_v20 = vpop.f32.mrf.mxu2 }
  0xb9   :  { %848 = vmatmul.msk.f32.gmra.mxu0 %vm418_vm2, %v417_v59  ;;  %845 = vmatmul.msk.f32.gmra.mxu1 %vm57_vm0, %v278_v46 }
  0xc0   :  { %v348_v23 = vpop.f32.mrf.mxu2 }
  0xc1   :  { %846 = vmatmul.msk.f32.gmra.mxu1 %vm57_vm0, %v279_v51 }
  0xc8   :  { %v351_v27 = vpop.f32.mrf.mxu2 }
  0xc9   :  { %853 = vmatmul.msk.f32.vlgmr.msra.gmra.mxu1 %vm418_vm2, %v448_v53 }
  0xd0   :  { %v473_v37 = vpop.f32.mrf.mxu2 }
  0xd1   :  { %854 = vmatmul.msk.f32.gmra.mxu1 %vm418_vm2, %v449_v57 }
  0xd8   :  { %v476_v46 = vpop.f32.mrf.mxu2 }
 0x106   :  { %v161_v63 = vpop.f32.mrf.mxu0 }
 0x107   :  { %v162_v0 = vadd.f32 %v886_v62, %v161_v63 }
 0x109   :  { %827 = vmatmul.msk.f32.vlgmr.msra.gmra.mxu3 %vm234_vm3, %v162_v0 }
 0x10a   :  { %493 = vmatpush.msra.mxu3 %v188_v1 }
 0x10c   :  { %494 = vmatpush.msra.mxu3 %v187_v4 }
 0x10e   :  { %v164_v2 = vpop.f32.mrf.mxu1  ;;  %v309_v26 = vpop.f32.mrf.mxu0 }
 0x10f   :  { %v165_v3 = vadd.f32 %v886_v62, %v164_v2 }
 0x111   :  { %828 = vmatmul.msk.f32.gmra.mxu3 %vm234_vm3, %v165_v3 }
 0x116   :  { %v167_v5 = vpop.f32.mrf.mxu1  ;;  %v312_v34 = vpop.f32.mrf.mxu0 }
 0x117   :  { %v168_v6 = vadd.f32 %v886_v62, %v167_v5 }
 0x119   :  { %829 = vmatmul.msk.f32.gmra.mxu3 %vm234_vm3, %v168_v6 }
 0x11e   :  { %v170_v7 = vpop.f32.mrf.mxu1  ;;  %v315_v43 = vpop.f32.mrf.mxu0 }
 0x11f   :  { %v171_v8 = vadd.f32 %v886_v62, %v170_v7 }
 0x121   :  { %830 = vmatmul.msk.f32.gmra.mxu3 %vm234_vm3, %v171_v8 }
 0x126   :  { %v400_v12 = vpop.f32.mrf.mxu1 }
 0x129   :  { %839 = vmatmul.msk.f32.vlgmr.msrb.gmra.mxu3 %vm234_vm3, %v162_v0 }
 0x12e   :  { %v403_v15 = vpop.f32.mrf.mxu1 }
 0x131   :  { %840 = vmatmul.msk.f32.gmra.mxu3 %vm234_vm3, %v165_v3 }
 0x136   :  { %v406_v18 = vpop.f32.mrf.mxu1 }
 0x139   :  { %841 = vmatmul.msk.f32.gmra.mxu3 %vm234_vm3, %v168_v6 }
 0x13e   :  { %v409_v21 = vpop.f32.mrf.mxu1 }
 0x141   :  { %842 = vmatmul.msk.f32.gmra.mxu3 %vm234_vm3, %v171_v8 }
 0x146   :  { %v519_v25 = vpop.f32.mrf.mxu1 }
 0x149   :  { %851 = vmatmul.msk.f32.vlgmr.msra.gmra.mxu3 %vm418_vm2, %v416_v56  ;;  %v318_v56 = vpop.f32.mrf.mxu0 }
 0x14e   :  { %v522_v31 = vpop.f32.mrf.mxu1 }
 0x151   :  { %852 = vmatmul.msk.f32.gmra.mxu3 %vm418_vm2, %v417_v59  ;;  %v442_v0 = vpop.f32.mrf.mxu0 }
 0x159   :  { %v445_v6 = vpop.f32.mrf.mxu0 }
 0x18c   :  { %v264_v14 = vpop.f32.mrf.mxu3 }
 0x18d   :  { %v265_v33 = vadd.f32 %v264_v14, %v222_v9 }
 0x18f   :  { %v321_v38 = vadd.f32 %v309_v26, %v265_v33 }
 0x191   :  { %v652_v41 = vadd.f32 %v473_v37, %v321_v38  ;;  %v525_v4 = vadd.f32 %v442_v0, %v321_v38 }
 0x194   :  { %v267_v17 = vpop.f32.mrf.mxu3 }
 0x195   :  { %v268_v42 = vadd.f32 %v267_v17, %v225_v10 }
 0x197   :  { %v322_v44 = vadd.f32 %v312_v34, %v268_v42 }
 0x199   :  { %v653_v50 = vadd.f32 %v476_v46, %v322_v44  ;;  %v526_v7 = vadd.f32 %v445_v6, %v322_v44 }
 0x19c   :  { %v270_v19 = vpop.f32.mrf.mxu3 }
 0x19d   :  { %v271_v51 = vadd.f32 %v270_v19, %v228_v11 }
 0x19f   :  { %v323_v54 = vadd.f32 %v315_v43, %v271_v51 }
 0x1a1   :  { %v715_v58 = vadd.f32 %v473_v37, %v323_v54  ;;  %v588_v5 = vadd.f32 %v442_v0, %v323_v54 }
 0x1a4   :  { %v273_v22 = vpop.f32.mrf.mxu3 }
 0x1a5   :  { %v274_v59 = vadd.f32 %v273_v22, %v231_v13 }
 0x1a7   :  { %v324_v60 = vadd.f32 %v318_v56, %v274_v59 }
 0x1a9   :  { %v716_v1 = vadd.f32 %v476_v46, %v324_v60  ;;  %v589_v8 = vadd.f32 %v445_v6, %v324_v60 }
 0x1ac   :  { %v371_v24 = vpop.f32.mrf.mxu3 }
 0x1ad   :  { %v372_v29 = vadd.f32 %v371_v24, %v342_v16 }
 0x1af   :  { %v412_v35 = vadd.f32 %v400_v12, %v372_v29 }
 0x1b1   :  { %v654_v40 = vadd.f32 %v519_v25, %v412_v35 }
 0x1b4   :  { %v374_v28 = vpop.f32.mrf.mxu3 }
 0x1b5   :  { %v375_v30 = vadd.f32 %v374_v28, %v345_v20 }
 0x1b7   :  { %v413_v32 = vadd.f32 %v403_v15, %v375_v30 }
 0x1b9   :  { %v655_v36 = vadd.f32 %v522_v31, %v413_v32 }
 0x1bb   :  { %863 = vmatpush.xpose.msk.msrb.mxu3 %vm234_vm3, %v655_v36 }
 0x1bc   :  { %v377_v39 = vpop.f32.mrf.mxu3 }
 0x1bd   :  { %v378_v47 = vadd.f32 %v377_v39, %v348_v23 }
 0x1bf   :  { %864 = vmatpush.xpose.msk.msrb.mxu3 %vm234_vm3, %v654_v40  ;;  %v414_v52 = vadd.f32 %v406_v18, %v378_v47 }
 0x1c1   :  { %v717_v57 = vadd.f32 %v519_v25, %v414_v52 }
 0x1c2   :  { %865 = vmatmul.msk.f32.vlgmr.msrb.gmra.mxu3 %vm234_vm3, %v652_v41 }
 0x1c4   :  { %v380_v45 = vpop.f32.mrf.mxu3 }
 0x1c5   :  { %v381_v48 = vadd.f32 %v380_v45, %v351_v27 }
 0x1c7   :  { %v415_v49 = vadd.f32 %v409_v21, %v381_v48 }
 0x1c9   :  { %v718_v53 = vadd.f32 %v522_v31, %v415_v49 }
 0x1ca   :  { %866 = vmatmul.msk.f32.gmra.mxu3 %vm234_vm3, %v653_v50 }
 0x1cb   :  { %867 = vmatpush.xpose.msk.msrb.mxu1 %vm234_vm3, %v718_v53 }
 0x1cc   :  { %v496_v55 = vpop.f32.mrf.mxu3 }
 0x1cd   :  { %v527_v2 = vadd.f32 %v496_v55, %v412_v35  ;;  %v590_v3 = vadd.f32 %v496_v55, %v414_v52 }
 0x1cf   :  { %868 = vmatpush.xpose.msk.msrb.mxu1 %vm234_vm3, %v717_v57 }
 0x1d2   :  { %869 = vmatmul.msk.f32.vlgmr.msrb.gmra.mxu1 %vm234_vm3, %v715_v58 }
 0x1d4   :  { %v499_v61 = vpop.f32.mrf.mxu3 }
 0x1d5   :  { %v528_v62 = vadd.f32 %v499_v61, %v413_v32  ;;  %v591_v63 = vadd.f32 %v499_v61, %v415_v49 }
 0x1d7   :  { %855 = vmatpush.xpose.msk.msra.mxu0 %vm234_vm3, %v528_v62  ;;  %859 = vmatpush.xpose.msk.msrb.mxu2 %vm234_vm3, %v591_v63 }
 0x1da   :  { %870 = vmatmul.msk.f32.gmra.mxu1 %vm234_vm3, %v716_v1 }
 0x1db   :  { %856 = vmatpush.xpose.msk.msra.mxu0 %vm234_vm3, %v527_v2  ;;  %860 = vmatpush.xpose.msk.msrb.mxu2 %vm234_vm3, %v590_v3 }
 0x1de   :  { %857 = vmatmul.msk.f32.vlgmr.msra.gmra.mxu0 %vm234_vm3, %v525_v4  ;;  %861 = vmatmul.msk.f32.vlgmr.msrb.gmra.mxu2 %vm234_vm3, %v588_v5 }
 0x1e6   :  { %858 = vmatmul.msk.f32.gmra.mxu0 %vm234_vm3, %v526_v7  ;;  %862 = vmatmul.msk.f32.gmra.mxu2 %vm234_vm3, %v589_v8 }
 0x245   :  { %v685_v9 = vpop.f32.mrf.mxu3 }
 0x246   :  { %v691_v10 = vsel %vm418_vm2, %v685_v9, -inf }
 0x247   :  { %692 = vmax.xlane.f32.xlu2 %v691_v10 }
 0x24d   :  { %v688_v11 = vpop.f32.mrf.mxu3 }
 0x24e   :  { %v694_v12 = vsel %vm418_vm2, %v688_v11, -inf }
 0x24f   :  { %695 = vmax.xlane.f32.xlu2 %v694_v12  ;;  %v748_v19 = vpop.f32.mrf.mxu1 }
 0x250   :  { %v754_v22 = vsel %vm418_vm2, %v748_v19, -inf }
 0x257   :  { %v751_v23 = vpop.f32.mrf.mxu1 }
 0x258   :  { %v757_v24 = vsel %vm418_vm2, %v751_v23, -inf }
 0x25b   :  { %v558_v13 = vpop.f32.mrf.mxu0 }
 0x25c   :  { %v564_v14 = vsel %vm418_vm2, %v558_v13, -inf }
 0x25d   :  { %565 = vmax.xlane.f32.xlu0 %v564_v14 }
 0x261   :  { %v621_v15 = vpop.f32.mrf.mxu2 }
 0x262   :  { %v627_v16 = vsel %vm418_vm2, %v621_v15, -inf }
 0x263   :  { %628 = vmax.xlane.f32.xlu1 %v627_v16  ;;  %v561_v17 = vpop.f32.mrf.mxu0 }
 0x264   :  { %v567_v18 = vsel %vm418_vm2, %v561_v17, -inf }
 0x265   :  { %568 = vmax.xlane.f32.xlu0 %v567_v18 }
 0x269   :  { %v624_v20 = vpop.f32.mrf.mxu2 }
 0x26a   :  { %v630_v21 = vsel %vm418_vm2, %v624_v20, -inf }
 0x26b   :  { %631 = vmax.xlane.f32.xlu1 %v630_v21 }
 0x26d   :  { %755 = vmax.xlane.f32.xlu0 %v754_v22 }
 0x273   :  { %758 = vmax.xlane.f32.xlu1 %v757_v24 }
 0x2ba   :  { %v693_v25 = vpop.xlane.xlu2 %692 }
 0x2bb   :  { %v697_v26 = vsub.f32 %v685_v9, %v693_v25 }
 0x2bd   :  { %v699_v27 = vmul.f32 1.442695, %v697_v26 }
 0x2bf   :  { %887 = vpow2.f32 %v699_v27 }
 0x2c2   :  { %v696_v33 = vpop.xlane.xlu2 %695 }
 0x2c3   :  { %v698_v37 = vsub.f32 %v688_v11, %v696_v33 }
 0x2c5   :  { %v888_v28 = vpop.eup %887  ;;  %v701_v43 = vmul.f32 1.442695, %v698_v37 }
 0x2c6   :  { %v703_v29 = vsel %vm418_vm2, %v888_v28, 0.0 }
 0x2c7   :  { %704 = vadd.xlane.f32.xlu0 %v703_v29 }
 0x2d0   :  { %v566_v30 = vpop.xlane.xlu0 %565 }
 0x2d1   :  { %v570_v31 = vsub.f32 %v558_v13, %v566_v30 }
 0x2d3   :  { %v572_v32 = vmul.f32 1.442695, %v570_v31 }
 0x2d5   :  { %889 = vpow2.f32 %v572_v32 }
 0x2d6   :  { %v629_v34 = vpop.xlane.xlu1 %628 }
 0x2d7   :  { %v633_v35 = vsub.f32 %v621_v15, %v629_v34 }
 0x2d8   :  { %v569_v36 = vpop.xlane.xlu0 %568 }
 0x2d9   :  { %v635_v38 = vmul.f32 1.442695, %v633_v35  ;;  %v571_v39 = vsub.f32 %v561_v17, %v569_v36 }
 0x2db   :  { %v890_v40 = vpop.eup %889  ;;  %891 = vpow2.f32 %v635_v38  ;;  %v574_v41 = vmul.f32 1.442695, %v571_v39 }
 0x2dc   :  { %v576_v42 = vsel %vm418_vm2, %v890_v40, 0.0 }
 0x2dd   :  { %893 = vpow2.f32 %v574_v41  ;;  %577 = vadd.xlane.f32.xlu2 %v576_v42 }
 0x2de   :  { %v632_v44 = vpop.xlane.xlu1 %631  ;;  %895 = vpow2.f32 %v701_v43 }
 0x2df   :  { %v634_v45 = vsub.f32 %v624_v20, %v632_v44 }
 0x2e0   :  { %v756_v46 = vpop.xlane.xlu0 %755 }
 0x2e1   :  { %v892_v47 = vpop.eup %891  ;;  %v637_v48 = vmul.f32 1.442695, %v634_v45  ;;  %v760_v49 = vsub.f32 %v748_v19, %v756_v46 }
 0x2e2   :  { %v639_v50 = vsel %vm418_vm2, %v892_v47, 0.0 }
 0x2e3   :  { %v894_v51 = vpop.eup %893  ;;  %897 = vpow2.f32 %v637_v48  ;;  %640 = vadd.xlane.f32.xlu1 %v639_v50  ;;  %v762_v53 = vmul.f32 1.442695, %v760_v49 }
 0x2e4   :  { %v579_v52 = vsel %vm418_vm2, %v894_v51, 0.0  ;;  %v896_v55 = vpop.eup %895 }
 0x2e5   :  { %580 = vadd.xlane.f32.xlu0 %v579_v52  ;;  %899 = vpow2.f32 %v762_v53  ;;  %v706_v59 = vsel %vm418_vm2, %v896_v55, 0.0 }
 0x2e6   :  { %v759_v54 = vpop.xlane.xlu1 %758 }
 0x2e7   :  { %v761_v56 = vsub.f32 %v751_v23, %v759_v54 }
 0x2e9   :  { %v898_v57 = vpop.eup %897  ;;  %v764_v58 = vmul.f32 1.442695, %v761_v56 }
 0x2ea   :  { %v642_v60 = vsel %vm418_vm2, %v898_v57, 0.0 }
 0x2eb   :  { %901 = vpow2.f32 %v764_v58  ;;  %707 = vadd.xlane.f32.xlu1 %v706_v59  ;;  %643 = vadd.xlane.f32.xlu2 %v642_v60  ;;  %v900_v61 = vpop.eup %899 }
 0x2ec   :  { %v766_v0 = vsel %vm418_vm2, %v900_v61, 0.0 }
 0x2f1   :  { %v902_v62 = vpop.eup %901 }
 0x2f2   :  { %v769_v63 = vsel %vm418_vm2, %v902_v62, 0.0 }
 0x2f3   :  { %770 = vadd.xlane.f32.xlu0 %v769_v63  ;;  %767 = vadd.xlane.f32.xlu2 %v766_v0 }
 0x33a   :  { %v705_v1 = vpop.xlane.xlu0 %704 }
 0x33b   :  { %903 = vrcp.f32 %v705_v1 }
 0x341   :  { %v904_v2 = vpop.eup %903 }
 0x342   :  { %v711_v3 = vmul.f32 %v904_v2, %v888_v28 }
 0x344   :  { %713 = vst.msk [vmem:[#allocation4] sm:$0xff] %vm418_vm2, %v711_v3 }
 0x350   :  { %v578_v4 = vpop.xlane.xlu2 %577 }
 0x351   :  { %905 = vrcp.f32 %v578_v4 }
 0x356   :  { %v641_v5 = vpop.xlane.xlu1 %640 }
 0x357   :  { %v906_v6 = vpop.eup %905  ;;  %907 = vrcp.f32 %v641_v5 }
 0x358   :  { %v584_v7 = vmul.f32 %v906_v6, %v890_v40  ;;  %v581_v8 = vpop.xlane.xlu0 %580 }
 0x359   :  { %909 = vrcp.f32 %v581_v8 }
 0x35a   :  { %586 = vst.msk [vmem:[#allocation2] sm:$0xff] %vm418_vm2, %v584_v7 }
 0x35d   :  { %v908_v9 = vpop.eup %907 }
 0x35e   :  { %v647_v10 = vmul.f32 %v908_v9, %v892_v47  ;;  %v708_v11 = vpop.xlane.xlu1 %707  ;;  %v644_v12 = vpop.xlane.xlu2 %643 }
 0x35f   :  { %v910_v13 = vpop.eup %909  ;;  %911 = vrcp.f32 %v708_v11 }
 0x360   :  { %650 = vst.msk [vmem:[#allocation2 + $0x10] sm:$0xff] %vm418_vm2, %v647_v10  ;;  %v585_v14 = vmul.f32 %v910_v13, %v894_v51  ;;  %913 = vrcp.f32 %v644_v12 }
 0x362   :  { %587 = vst.msk [vmem:[#allocation2 + $0x8] sm:$0xff] %vm418_vm2, %v585_v14 }
 0x365   :  { %v912_v15 = vpop.eup %911 }
 0x366   :  { %v914_v16 = vpop.eup %913  ;;  %v712_v17 = vmul.f32 %v912_v15, %v896_v55  ;;  %v768_v18 = vpop.xlane.xlu2 %767 }
 0x367   :  { %v771_v19 = vpop.xlane.xlu0 %770  ;;  %v648_v20 = vmul.f32 %v914_v16, %v898_v57  ;;  %915 = vrcp.f32 %v768_v18 }
 0x368   :  { %714 = vst.msk [vmem:[#allocation4 + $0x8] sm:$0xff] %vm418_vm2, %v712_v17  ;;  %917 = vrcp.f32 %v771_v19 }
 0x369   :  { %651 = vst.msk [vmem:[#allocation2 + $0x18] sm:$0xff] %vm418_vm2, %v648_v20 }
 0x36a   :  { %791 = dma.vmem_to_hbm [thread:$0]  %s784_s30, 512, %s786_s8, [#allocation3], %s972_s17, %s972_s17, %s973_s18  }
 0x36d   :  { %v916_v21 = vpop.eup %915 }
 0x36e   :  { %v918_v22 = vpop.eup %917  ;;  %v774_v23 = vmul.f32 %v916_v21, %v900_v61 }
 0x36f   :  { %v775_v24 = vmul.f32 %v918_v22, %v902_v62 }
 0x370   :  { %777 = vst.msk [vmem:[#allocation4 + $0x10] sm:$0xff] %vm418_vm2, %v774_v23 }
 0x371   :  { %778 = vst.msk [vmem:[#allocation4 + $0x18] sm:$0xff] %vm418_vm2, %v775_v24 }
 0x372   :  { %804 = dma.vmem_to_hbm [thread:$0]  %s797_s0, 512, %s799_s20, [#allocation5], %s972_s17, %s972_s17, %s973_s18  }
 0x373   :  { %967 = dma.done.wait [#allocation3], 512  }
 0x374   :  { %968 = vsyncadd [#allocation3], 4294966784 }
 0x375   :  { %969 = dma.done.wait [#allocation5], 512  }
 0x376   :  { %970 = vsyncadd [#allocation5], 4294966784 }
 0x377   :  { %813 = vsyncpa [#allocation3], 1 }
 0x378   :  { %814 = vsyncpa [#allocation5], 1 }

</bundles_post_ra>
